<compile_context>
chip_gen: v6e
topology: v6e:2x2x1
jax: 0.10.0
libtpu: 0.0.40
codegen_flags: <defaults>
</compile_context>

<pallas_src>
import functools

import jax
import jax.numpy as jnp
from jax.experimental import pallas as pl
from jax.experimental.pallas import tpu as pltpu


def _pick_batch_tile(batch: int, seq_len: int, row_target: int) -> int:
    """Largest divisor of `batch` whose row tile (tile_b * L) is sublane-clean
    (multiple of 8) and <= row_target.  Falls back to the full batch (block
    dims == full array dims is always a legal BlockSpec), so no padding of the
    row axis is ever required."""
    if batch * seq_len <= row_target:
        return batch
    best = None
    for t in range(1, batch + 1):
        if batch % t:
            continue
        rows = t * seq_len
        if rows <= row_target and rows % 8 == 0:
            best = t
    return best if best is not None else batch


def _timae_conv1d_kernel(x_ref, w_ref, b_ref, o_ref, *, seq_len: int):
    # x_ref: (tile_m, C_in)  f32 -- tile_m rows = whole sequences back to back
    # w_ref: (3, C_in, C_out) f32 -- conv taps, tap-major (t-1, t, t+1)
    # b_ref: (1, C_out)       f32
    # o_ref: (tile_m, C_out)  f32 -- true output width (no lane padding)
    x = x_ref[...]
    tile_m, c_in = x.shape

    # --- in-kernel im2col: sublane shift + sequence-boundary masking ---------
    # Tiles contain whole sequences, so shifted rows never need halo data from
    # another tile; the pos-based masks also realise the conv's padding=1 edge
    # zeros.  The shift is a slice+concat (equivalent to a sublane roll); it
    # runs on XLU/VPU slack in this memory-bound kernel.
    pos = jax.lax.broadcasted_iota(jnp.int32, (tile_m, 1), 0) % seq_len
    zrow = jnp.zeros((1, c_in), x.dtype)
    x_prev = jnp.concatenate([zrow, x[:-1, :]], axis=0)        # row t -> x[t-1]
    x_next = jnp.concatenate([x[1:, :], zrow], axis=0)         # row t -> x[t+1]
    x_prev = jnp.where(pos == 0, 0.0, x_prev)                  # sequence start
    x_next = jnp.where(pos == seq_len - 1, 0.0, x_next)        # sequence end

    # Three tiny-K MXU matmuls (K = C_in); f32 accumulation, f32 bias add.
    acc = jnp.dot(x_prev, w_ref[0], preferred_element_type=jnp.float32)
    acc = acc + jnp.dot(x, w_ref[1], preferred_element_type=jnp.float32)
    acc = acc + jnp.dot(x_next, w_ref[2], preferred_element_type=jnp.float32)
    o_ref[...] = (acc + b_ref[...]).astype(o_ref.dtype)


def prepare_timae_embedding_params(weight, bias):
    """Hoisted parameter prep (call once, not per forward).

    PyTorch Conv1d weight (C_out, C_in, 3) -> tap-major (3, C_in, C_out),
    bias (C_out,) -> (1, C_out).
    """
    w_taps = jnp.transpose(weight, (2, 1, 0)).astype(jnp.float32)
    bias_row = bias.reshape(1, -1).astype(jnp.float32)
    return w_taps, bias_row


def ti_mae_embedding(x, w_taps, bias_row, *, row_tile_target=2048):
    """Pallas forward of TiMAEEmbedding.

    Args:
      x:        (B, L, C_in) float32
      w_taps:   (3, C_in, C_out) float32 (from prepare_timae_embedding_params)
      bias_row: (1, C_out) float32

    Returns:
      (B, L, C_out) float32
    """
    B, L, C_in = x.shape
    C_out = w_taps.shape[-1]
    M = B * L

    tile_b = _pick_batch_tile(B, L, row_tile_target)
    tile_m = tile_b * L      # tiles hold whole sequences -> shifts need no halo
    # TODO(synk): for very long single sequences (so a (L, C_in) tile exceeds a
    # few MiB of VMEM), tile L with a 1-row halo via manual make_async_copy.

    x2 = x.reshape(M, C_in)  # row-major collapse: free, no extra HBM pass

    out = pl.pallas_call(
        functools.partial(_timae_conv1d_kernel, seq_len=L),
        out_shape=jax.ShapeDtypeStruct((M, C_out), x.dtype),
        grid=(M // tile_m,),
        in_specs=[
            # Activation stream: read exactly once, tile over rows.
            pl.BlockSpec((tile_m, C_in), lambda i: (i, 0)),
            # Constant parameters: same block every step (resident in VMEM).
            pl.BlockSpec((3, C_in, C_out), lambda i: (0, 0, 0)),
            pl.BlockSpec((1, C_out), lambda i: (0, 0)),
        ],
        # True-width output block (C_out == full last dim -> legal BlockSpec).
        out_specs=pl.BlockSpec((tile_m, C_out), lambda i: (i, 0)),
        compiler_params=pltpu.CompilerParams(
            # Row tiles are independent -> shard across TensorCores (v7x).
            dimension_semantics=("parallel",),
        ),
    )(x2, w_taps, bias_row)

    return out.reshape(B, L, C_out)


def _reference(x, weight, bias):
    """Plain-JAX reference matching PyTorch Conv1d(k=3, padding=1) on (B, L, C)."""
    B, L, C_in = x.shape
    C_out = weight.shape[0]
    x_pad = jnp.pad(x, ((0, 0), (1, 1), (0, 0)))
    y = jnp.zeros((B, L, C_out), jnp.float32)
    for k in range(3):
        y = y + jnp.einsum("blc,oc->blo", x_pad[:, k:k + L, :], weight[:, :, k])
    return y + bias[None, None, :]


if __name__ == "__main__":
    # Module config: input_dim=4, emb_size=32; input shape (B=2, L=8, C_in=4).
    input_dim, emb_size = 4, 32
    B, L = 2, 8

    key = jax.random.PRNGKey(0)
    kx, kw, kb = jax.random.split(key, 3)

    x = jax.random.normal(kx, (B, L, input_dim), dtype=jnp.float32)

    # Deterministic parameter init (PyTorch-style uniform bound 1/sqrt(fan_in)).
    fan_in = input_dim * 3
    bound = 1.0 / (fan_in ** 0.5)
    weight = jax.random.uniform(
        kw, (emb_size, input_dim, 3), minval=-bound, maxval=bound,
        dtype=jnp.float32)
    bias = jax.random.uniform(
        kb, (emb_size,), minval=-bound, maxval=bound, dtype=jnp.float32)

    # Parameter prep hoisted out of the forward path (done once).
    w_taps, bias_row = prepare_timae_embedding_params(weight, bias)

    out = ti_mae_embedding(x, w_taps, bias_row)
    out = jax.block_until_ready(out)

    ref = _reference(x, weight, bias)
    assert out.shape == (B, L, emb_size), out.shape
    assert jnp.allclose(out, ref, atol=1e-5, rtol=1e-5), (
        float(jnp.max(jnp.abs(out - ref))))

    print("KERNEL_OK")
</pallas_src>

<mosaic_0001>
module attributes {stable_mosaic.version = 11 : i64} {
  func.func @_timae_conv1d_kernel(%arg0: i32, %arg1: memref<16x4xf32, #tpu.memory_space<vmem>>, %arg2: memref<3x4x32xf32, #tpu.memory_space<vmem>>, %arg3: memref<1x32xf32, #tpu.memory_space<vmem>>, %arg4: memref<16x32xf32, #tpu.memory_space<vmem>>) attributes {dimension_semantics = [#tpu.dimension_semantics<parallel>], iteration_bounds = array<i64: 1>, scalar_prefetch = 0 : i64, scratch_operands = 0 : i64, tpu.core_type = #tpu.core_type<tc>, window_params = [{transform_indices = @transform_0, window_bounds = array<i64: 16, 4>}, {pipeline_mode = #tpu.pipeline_mode<synchronous>, transform_indices = @transform_1, window_bounds = array<i64: 3, 4, 32>}, {pipeline_mode = #tpu.pipeline_mode<synchronous>, transform_indices = @transform_2, window_bounds = array<i64: 1, 32>}, {transform_indices = @transform_3, window_bounds = array<i64: 16, 32>}]} {
    %c0 = arith.constant 0 : index
    %c0_0 = arith.constant 0 : index
    %0 = vector.load %arg1[%c0, %c0_0] : memref<16x4xf32, #tpu.memory_space<vmem>>, vector<16x4xf32>
    %1 = tpu.iota {dimensions = array<i32: 0>} : vector<16x1xi32>
    %c8_i32 = arith.constant 8 : i32
    %c0_i32 = arith.constant 0 : i32
    %2 = arith.cmpi eq, %c8_i32, %c0_i32 : i32
    %c1_i32 = arith.constant 1 : i32
    %3 = arith.select %2, %c1_i32, %c8_i32 : i32
    %4 = vector.broadcast %3 : i32 to vector<16x1xi32>
    %5 = arith.remsi %1, %4 : vector<16x1xi32>
    %c0_i32_1 = arith.constant 0 : i32
    %6 = vector.broadcast %c0_i32_1 : i32 to vector<16x1xi32>
    %7 = arith.cmpi ne, %5, %6 : vector<16x1xi32>
    %c0_i32_2 = arith.constant 0 : i32
    %8 = vector.broadcast %c0_i32_2 : i32 to vector<16x1xi32>
    %9 = arith.cmpi slt, %5, %8 : vector<16x1xi32>
    %c0_i32_3 = arith.constant 0 : i32
    %10 = arith.cmpi slt, %3, %c0_i32_3 : i32
    %11 = vector.broadcast %10 : i1 to vector<16x1xi1>
    %12 = vector.broadcast %11 : vector<16x1xi1> to vector<16x1xi1>
    %13 = arith.xori %9, %12 : vector<16x1xi1>
    %14 = arith.andi %13, %7 : vector<16x1xi1>
    %15 = vector.broadcast %3 : i32 to vector<16x1xi32>
    %16 = arith.addi %5, %15 : vector<16x1xi32>
    %17 = arith.select %14, %16, %5 : vector<16x1xi1>, vector<16x1xi32>
    %cst = arith.constant 0.000000e+00 : f32
    %18 = vector.broadcast %cst : f32 to vector<1x4xf32>
    %19 = vector.extract_strided_slice %0 {offsets = [0, 0], sizes = [15, 4], strides = [1, 1]} : vector<16x4xf32> to vector<15x4xf32>
    %20 = tpu.concatenate %18, %19 in 0 : vector<1x4xf32>, vector<15x4xf32> -> vector<16x4xf32>
    %21 = vector.extract_strided_slice %0 {offsets = [1, 0], sizes = [15, 4], strides = [1, 1]} : vector<16x4xf32> to vector<15x4xf32>
    %22 = tpu.concatenate %21, %18 in 0 : vector<15x4xf32>, vector<1x4xf32> -> vector<16x4xf32>
    %c0_i32_4 = arith.constant 0 : i32
    %23 = vector.broadcast %c0_i32_4 : i32 to vector<16x1xi32>
    %24 = arith.cmpi eq, %17, %23 : vector<16x1xi32>
    %cst_5 = arith.constant 0.000000e+00 : f32
    %25 = vector.shape_cast %24 : vector<16x1xi1> to vector<16x1xi1>
    %26 = vector.broadcast %25 : vector<16x1xi1> to vector<16x4xi1>
    %27 = vector.broadcast %cst_5 : f32 to vector<16x4xf32>
    %28 = arith.select %26, %27, %20 : vector<16x4xi1>, vector<16x4xf32>
    %c7_i32 = arith.constant 7 : i32
    %29 = vector.broadcast %c7_i32 : i32 to vector<16x1xi32>
    %30 = arith.cmpi eq, %17, %29 : vector<16x1xi32>
    %cst_6 = arith.constant 0.000000e+00 : f32
    %31 = vector.shape_cast %30 : vector<16x1xi1> to vector<16x1xi1>
    %32 = vector.broadcast %31 : vector<16x1xi1> to vector<16x4xi1>
    %33 = vector.broadcast %cst_6 : f32 to vector<16x4xf32>
    %34 = arith.select %32, %33, %22 : vector<16x4xi1>, vector<16x4xf32>
    %c0_7 = arith.constant 0 : index
    %c0_8 = arith.constant 0 : index
    %c0_9 = arith.constant 0 : index
    %35 = vector.load %arg2[%c0_7, %c0_8, %c0_9] : memref<3x4x32xf32, #tpu.memory_space<vmem>>, vector<1x4x32xf32>
    %36 = vector.shape_cast %35 : vector<1x4x32xf32> to vector<4x32xf32>
    %cst_10 = arith.constant dense<0.000000e+00> : vector<16x32xf32>
    %37 = tpu.matmul %28, %36, %cst_10 {dimension_numbers = #tpu.dot_dimension_numbers<[1], [0], [0], [1], [0, 0, 1, 1], [], []>} : vector<16x4xf32>, vector<4x32xf32>, vector<16x32xf32> -> vector<16x32xf32>
    %c1 = arith.constant 1 : index
    %c0_11 = arith.constant 0 : index
    %c0_12 = arith.constant 0 : index
    %38 = vector.load %arg2[%c1, %c0_11, %c0_12] : memref<3x4x32xf32, #tpu.memory_space<vmem>>, vector<1x4x32xf32>
    %39 = vector.shape_cast %38 : vector<1x4x32xf32> to vector<4x32xf32>
    %cst_13 = arith.constant dense<0.000000e+00> : vector<16x32xf32>
    %40 = tpu.matmul %0, %39, %cst_13 {dimension_numbers = #tpu.dot_dimension_numbers<[1], [0], [0], [1], [0, 0, 1, 1], [], []>} : vector<16x4xf32>, vector<4x32xf32>, vector<16x32xf32> -> vector<16x32xf32>
    %41 = arith.addf %37, %40 : vector<16x32xf32>
    %c2 = arith.constant 2 : index
    %c0_14 = arith.constant 0 : index
    %c0_15 = arith.constant 0 : index
    %42 = vector.load %arg2[%c2, %c0_14, %c0_15] : memref<3x4x32xf32, #tpu.memory_space<vmem>>, vector<1x4x32xf32>
    %43 = vector.shape_cast %42 : vector<1x4x32xf32> to vector<4x32xf32>
    %cst_16 = arith.constant dense<0.000000e+00> : vector<16x32xf32>
    %44 = tpu.matmul %34, %43, %cst_16 {dimension_numbers = #tpu.dot_dimension_numbers<[1], [0], [0], [1], [0, 0, 1, 1], [], []>} : vector<16x4xf32>, vector<4x32xf32>, vector<16x32xf32> -> vector<16x32xf32>
    %45 = arith.addf %41, %44 : vector<16x32xf32>
    %c0_17 = arith.constant 0 : index
    %c0_18 = arith.constant 0 : index
    %46 = vector.load %arg3[%c0_17, %c0_18] : memref<1x32xf32, #tpu.memory_space<vmem>>, vector<1x32xf32>
    %47 = vector.broadcast %46 : vector<1x32xf32> to vector<16x32xf32>
    %48 = arith.addf %45, %47 : vector<16x32xf32>
    %c0_19 = arith.constant 0 : index
    %c0_20 = arith.constant 0 : index
    %49 = vector.load %arg4[%c0_19, %c0_20] : memref<16x32xf32, #tpu.memory_space<vmem>>, vector<16x32xf32>
    tpu.vector_store %arg4[%c0_19, %c0_20], %48 {strides = array<i32>} : memref<16x32xf32, #tpu.memory_space<vmem>>, vector<16x32xf32>,
    return
  }
  func.func @transform_0(%arg0: i32) -> (i32, i32) {
    %c0_i32 = arith.constant 0 : i32
    %c0_i32_0 = arith.constant 0 : i32
    return %arg0, %c0_i32 : i32, i32
  }
  func.func @transform_1(%arg0: i32) -> (i32, i32, i32) {
    %c0_i32 = arith.constant 0 : i32
    %c0_i32_0 = arith.constant 0 : i32
    %c0_i32_1 = arith.constant 0 : i32
    %c0_i32_2 = arith.constant 0 : i32
    return %c0_i32, %c0_i32_0, %c0_i32_1 : i32, i32, i32
  }
  func.func @transform_2(%arg0: i32) -> (i32, i32) {
    %c0_i32 = arith.constant 0 : i32
    %c0_i32_0 = arith.constant 0 : i32
    %c0_i32_1 = arith.constant 0 : i32
    return %c0_i32, %c0_i32_0 : i32, i32
  }
  func.func @transform_3(%arg0: i32) -> (i32, i32) {
    %c0_i32 = arith.constant 0 : i32
    %c0_i32_0 = arith.constant 0 : i32
    return %arg0, %c0_i32 : i32, i32
  }
}

</mosaic_0001>

<bundles_post_ra>
// kernel: tpu_custom_call.1
= control target key start
LH: loop header
LB: loop body
LE: loop exit
PB: predicated region body
PF: predicated region fallthrough
CT: control target
= control target key end

     0   :  { %vm84_vm0 = vcmask 1043456   ;;  %vm79_vm1 = vcmask 31744   ;;  %v17_v3 = vlaneseq  ;;  %vm46_vm2 = vcmask 1040384   ;;  %s482_s0 = inlined_call_operand.vmem [shape: f32[16,4], index: 0, kind: input, shape index: {}]   ;;  %s483_s1 = inlined_call_operand.vmem [shape: f32[3,4,32], index: 1, kind: input, shape index: {}]   ;;  %s484_s2 = inlined_call_operand.vmem [shape: f32[1,32], index: 2, kind: input, shape index: {}]   ;;  %s485_s3 = inlined_call_operand.hbm [shape: f32[16,32], index: 3, kind: output, shape index: {}]  }
   0x1   :  { %v363_v0 = vld [vmem:[%s483_s1 + $0x4] sm:$0xf]  ;;  %v16_v2 = vld [vmem:[%s482_s0 + $0x8] sm:$0xff]  ;;  %v76_v8 = vld [vmem:[%s483_s1] sm:$0xf]  ;;  %vm53_vm3 = vcmask 1046528  }
   0x2   :  { %v15_v1 = vld [vmem:[%s482_s0] sm:$0xff]  ;;  %384 = vmatprep.subr.msk.mxu0 %vm84_vm0, %v363_v0  ;;  %v55_v5 = vrot.slane %v16_v2, 1  ;;  %v370_v6 = vld [vmem:[%s483_s1 + $0x8] sm:$0xf]  ;;  %v48_v7 = vrot.slane %v16_v2, 7  ;;  %v18_v9 = vshrl.u32 %v17_v3, 7 }
   0x3   :  { %v54_v4 = vrot.slane %v15_v1, 1  ;;  %386 = vmatprep.mubr.msk.f32.mxu0 %vm79_vm1, %v15_v1  ;;  %385 = vmatpush3.msk.msra.mxu0 %vm84_vm0, %v363_v0  ;;  %v47_v10 = vrot.slane %v15_v1, 7 }
   0x4   :  { %387 = vmatmul.mubr.msk.f32.vlgmr.msra.gmra.mxu0 %vm79_vm1, %v16_v2  ;;  %394 = vmatprep.subr.msk.mxu0 %vm84_vm0, %v370_v6 }
   0x5   :  { %8 = vsyncpa [#allocation3], 0  ;;  %389 = vmatprep.subr.msk.mxu1 %vm84_vm0, %v76_v8  ;;  %395 = vmatpush3.msk.msra.mxu0 %vm84_vm0, %v370_v6  ;;  %v24_v11 = vand.u32 7, %v18_v9  ;;  %v52_v12 = vsel %vm46_vm2, 0.0, %v47_v10  ;;  %v56_v13 = vsel %vm53_vm3, %v54_v4, %v55_v5  ;;  %v19_v14 = vadd.s32 8, %v18_v9  ;;  %s424_s22 = smov [#allocation2]  }
   0x6   :  { %390 = vmatpush3.msk.msra.mxu1 %vm84_vm0, %v76_v8  ;;  %v59_v15 = vsel %vm53_vm3, %v55_v5, 0.0  ;;  %v49_v17 = vsel %vm46_vm2, %v47_v10, %v48_v7  ;;  %v374_v27 = vld [vmem:[%s484_s2] ss:$0 sm:$0xff]  ;;  %s352_s23 = sshll.u32 %s424_s22, 4  ;;  %vm344_vm8 = vcmask 261120   ;;  %s353_s23 = int_to_ptr.vmem [resolvable:$true] %s352_s23 }
   0x7   :  { %vm60_vm4 = vcmp.eq.s32.totalorder %v24_v11, 0  ;;  %vm68_vm5 = vcmp.eq.s32.totalorder %v24_v11, 7  ;;  %v31_v16 = vand.u32 7, %v19_v14  ;;  %s402_s24 = scalar_lea.vmem %s353_s23, 256  ;;  %p407_p1 = scmp.lt.s32.totalorder %s353_s23, %s353_s23 }
   0x8   :  { %v66_v18 = vsel %vm60_vm4, 0.0, %v52_v12  ;;  %v74_v19 = vsel %vm68_vm5, 0.0, %v56_v13  ;;  %p403_p0 = scmp.ne.s32.totalorder %s353_s23, %s402_s24  ;;  %p408_p2 = scmp.lt.s32.totalorder %s402_s24, %s402_s24 }
   0x9   :  { %391 = vmatprep.mubr.msk.f32.mxu1 %vm79_vm1, %v66_v18  ;;  %396 = vmatprep.mubr.msk.f32.mxu0 %vm79_vm1, %v74_v19  ;;  %vm61_vm6 = vcmp.eq.s32.totalorder %v31_v16, 0  ;;  %vm69_vm7 = vcmp.eq.s32.totalorder %v31_v16, 7 }
   0xa   :  { %v67_v20 = vsel %vm61_vm6, 0.0, %v49_v17  ;;  %v75_v21 = vsel %vm69_vm7, 0.0, %v59_v15  ;;  %p409_p3 = por %p408_p2, %p407_p1 }
   0xb   :  { %392 = vmatmul.mubr.msk.f32.vlgmr.msra.gmra.mxu1 %vm79_vm1, %v67_v20  ;;  %397 = vmatmul.mubr.msk.f32.vlgmr.msra.gmra.mxu0 %vm79_vm1, %v75_v21 }
   0xc   :  { %p410_p4 = pnand %p409_p3, %p403_p0 }
  0xc4   :  { %v388_v22 = vpop.f32.mrf.mxu0 }
  0xc6   :  { %v154_v23 = vpop.f32.mrf.mxu0 }
  0xcb   :  { %v393_v24 = vpop.f32.mrf.mxu1  ;;  %v398_v25 = vpop.f32.mrf.mxu0 }
  0xcc   :  { %v244_v26 = vadd.f32 %v393_v24, %v388_v22 }
  0xcd   :  { %v238_v28 = vpop.f32.mrf.mxu1  ;;  %v324_v31 = vpop.f32.mrf.mxu0 }
  0xce   :  { %v334_v29 = vadd.f32 %v398_v25, %v244_v26  ;;  %v239_v30 = vadd.f32 %v238_v28, %v154_v23 }
  0xd0   :  { %v343_v32 = vadd.f32 %v374_v27, %v334_v29  ;;  %v333_v33 = vadd.f32 %v324_v31, %v239_v30 }
  0xd2   :  { %346 = vst.msk [vmem:[#allocation2 + $0x8] sm:$0xff] %vm344_vm8, %v343_v32  ;;  %v342_v34 = vadd.f32 %v374_v27, %v333_v33 }
  0xd4   :  { %345 = vst.msk [vmem:[#allocation2] sm:$0xff] %vm344_vm8, %v342_v34 }
  0xd5   :  { %413 = shalt.err (!%p410_p4)
}
  0xd6   :  { %s425_s2 = smov 128   ;;  %s426_s25 = smov 8  }
  0xd7   :  { %358 = dma.vmem_to_hbm [thread:$0]  %s353_s23, 256, %s485_s3, [#allocation3], %s425_s2, %s425_s2, %s426_s25  }
  0xd8   :  { %422 = dma.done.wait [#allocation3], 256  }
  0xd9   :  { %423 = vsyncadd [#allocation3], 4294967040 }
  0xda   :  { %362 = vsyncpa [#allocation3], 1 }

</bundles_post_ra>
